<compile_context>
chip_gen: v7x
topology: tpu7x:2x2x1
jax: 0.10.0
libtpu: 0.0.40
codegen_flags: <defaults>
</compile_context>

<pallas_src>
import math
import functools

import jax
import jax.numpy as jnp
from jax import lax
from jax.experimental import pallas as pl
from jax.experimental.pallas import tpu as pltpu


def _tpu_vmem_bytes():
    try:
        return int(pltpu.get_tpu_info().vmem_capacity_bytes)
    except Exception:
        return 64 << 20          # v7x lower bound; safe everywhere


def _round_up(x, m):
    return ((x + m - 1) // m) * m


# --------------------------------------------------------------------------
# kernel A: per-(batch, pixel-tile) partial BN statistics of sigma = w @ x
# --------------------------------------------------------------------------
def _stats_kernel(x_ref, w_ref, psum_ref, psq_ref, *, p_total, tp):
    """x_ref: (1, C, TP) lane-dense pixel tile; w_ref: (G, C).
    psum_ref/psq_ref: (1, 1, G, 1) per-tile partial sums (no residency)."""
    xb = x_ref[0]                                                    # (C, TP)
    if p_total % tp != 0:
        # Mask the out-of-bounds lanes of the (possibly partial) last tile.
        start = pl.program_id(1) * tp
        lane = lax.broadcasted_iota(jnp.int32, (1, tp), 1)
        xb = jnp.where(start + lane < p_total, xb, jnp.zeros_like(xb))
    s = jnp.dot(w_ref[...], xb, preferred_element_type=jnp.float32)  # (G, TP)
    psum_ref[...] = jnp.sum(s, axis=1, keepdims=True)[None, None]
    psq_ref[...] = jnp.sum(s * s, axis=1, keepdims=True)[None, None]


# --------------------------------------------------------------------------
# kernel B: fused (recompute sigma) + BN affine + softmax + reweight + stride
# --------------------------------------------------------------------------
def _apply_kernel(x_ref, w_ref, sel_ref, scale_ref, bias_ref, o_ref, *,
                  stride, group, rows_out):
    """x_ref: (1, C, H_blk_in, W) raw input rows (H already block-strided by
    the BlockSpec); sel_ref: (W, W_out) 0/1 column-selection; w_ref: (G, C);
    scale/bias: (G, 1) folded BN affine; o_ref: (1, C, rows_out, W_out)."""
    c = o_ref.shape[1]
    cg = c // group
    wk = w_ref[...].astype(jnp.float32)                              # (G, C)
    sel = sel_ref[...]                                               # (W, W_out)
    scale = scale_ref[...]
    bias = bias_ref[...]

    # rows_out is small (<= 32) by construction: static unroll, static indices.
    for r in range(rows_out):
        xr = x_ref[0, :, r * stride, :]                              # (C, W)
        # W-stride via a tiny 0/1 matmul (exact copy of the kept columns).
        xq = jnp.dot(xr, sel, preferred_element_type=jnp.float32)    # (C, Wo)
        s = jnp.dot(wk, xq, preferred_element_type=jnp.float32)      # (G, Wo)
        s = s * scale + bias
        s = s - jnp.max(s, axis=0, keepdims=True)
        e = jnp.exp(s)
        soft = e / jnp.sum(e, axis=0, keepdims=True)                 # (G, Wo)
        # Expand group weights to channels with per-group broadcast multiplies
        # (VPU) instead of a (C,G)@(G,Wo) matmul.
        parts = [xq[gi * cg:(gi + 1) * cg, :] * soft[gi:gi + 1, :]
                 for gi in range(group)]
        out = parts[0] if group == 1 else jnp.concatenate(parts, axis=0)
        o_ref[0, :, r, :] = out.astype(o_ref.dtype)


# --------------------------------------------------------------------------
# wrapper
# --------------------------------------------------------------------------
def downsample_pasa_group_softmax(x_nchw, conv_w, bn_gamma, bn_beta, *,
                                  stride=2, group=2, kernel_size=1, eps=1e-5,
                                  max_rows_per_block=None):
    """Forward of Downsample_PASA_group_softmax (training-mode BatchNorm).
    NCHW in / NCHW out.  Only kernel_size=1 (the module default) is handled."""
    # TODO(synk): general kernel_size would additionally need reflection
    # padding + an unfold kernel; only the default kernel_size=1 is implemented.
    assert kernel_size == 1
    n, c, h, w = x_nchw.shape
    g = group * kernel_size * kernel_size
    assert c % group == 0 and stride >= 1

    dt = x_nchw.dtype
    elem = jnp.dtype(dt).itemsize
    w_gc = conv_w.reshape(g, c).astype(dt)                           # (G, C)

    vmem_cap = _tpu_vmem_bytes()
    blk_budget = max(1 << 20, min(vmem_cap // 8, 8 << 20))           # per block
    vmem_limit = int(min(vmem_cap * 3 // 4, 112 << 20))

    # ---- kernel A: partial BN stats over all pixels (x stays in HBM layout) --
    p_in = h * w
    x_flat = x_nchw.reshape(n, c, p_in)                              # free view
    if p_in <= 128:
        tp = p_in
    else:
        tp = min(blk_budget // max(c * elem, 1), 32768, _round_up(p_in, 128))
        tp = max(128, (tp // 128) * 128)
    t_tiles = pl.cdiv(p_in, tp)

    part_sum, part_sq = pl.pallas_call(
        functools.partial(_stats_kernel, p_total=p_in, tp=tp),
        out_shape=(jax.ShapeDtypeStruct((n, t_tiles, g, 1), jnp.float32),
                   jax.ShapeDtypeStruct((n, t_tiles, g, 1), jnp.float32)),
        grid=(n, t_tiles),
        in_specs=[pl.BlockSpec((1, c, tp), lambda b, t: (b, 0, t)),
                  pl.BlockSpec((g, c), lambda b, t: (0, 0))],
        out_specs=(pl.BlockSpec((1, 1, g, 1), lambda b, t: (b, t, 0, 0)),
                   pl.BlockSpec((1, 1, g, 1), lambda b, t: (b, t, 0, 0))),
        compiler_params=pltpu.CompilerParams(
            dimension_semantics=("parallel", "parallel"),
            vmem_limit_bytes=vmem_limit),
    )(x_flat, w_gc)

    # ---- glue: fold BatchNorm (batch statistics) into per-group scale/bias ---
    # NOTE: E[s^2] - E[s]^2 in f32 is adequate here (sigma is ~zero-centered
    # for kaiming conv weights on zero-mean inputs); many per-tile partials are
    # summed tree-wise by XLA which further limits cancellation.
    cnt = jnp.float32(n * p_in)
    ssum = jnp.sum(part_sum[..., 0], axis=(0, 1))                    # (G,)
    ssq = jnp.sum(part_sq[..., 0], axis=(0, 1))                      # (G,)
    mean = ssum / cnt
    var = jnp.maximum(ssq / cnt - mean * mean, 0.0)                  # biased var
    scale = bn_gamma.astype(jnp.float32).reshape(g) * lax.rsqrt(var + eps)
    bias = bn_beta.astype(jnp.float32).reshape(g) - mean * scale
    scale = scale.reshape(g, 1)
    bias = bias.reshape(g, 1)

    # ---- kernel B: fused stride + BN-apply + softmax + reweight --------------
    h_out = -(-h // stride)
    w_out = -(-w // stride)
    # 0/1 column-selection matrix (W, W_out): picks columns 0, stride, 2*stride...
    sel = (jnp.arange(w)[:, None] ==
           jnp.arange(w_out)[None, :] * stride).astype(dt)

    if h_out <= 8:
        rows_blk = h_out
    else:
        per_row_bytes = max(c * stride * w * elem, 1)                # input rows
        rows_budget = max(1, blk_budget // per_row_bytes)
        rows_blk = min(32, max(8, (rows_budget // 8) * 8), _round_up(h_out, 8))
        if max_rows_per_block is not None:
            rows_blk = min(rows_blk, max(8, (max_rows_per_block // 8) * 8))
    n_rb = pl.cdiv(h_out, rows_blk)
    if n_rb == 1:
        rows_blk = h_out
        blk_h_in = h                      # full H in one block (full-dim escape)
    else:
        blk_h_in = rows_blk * stride      # multiple of 8 (rows_blk is)

    out = pl.pallas_call(
        functools.partial(_apply_kernel, stride=stride, group=group,
                          rows_out=rows_blk),
        out_shape=jax.ShapeDtypeStruct((n, c, h_out, w_out), dt),
        grid=(n, n_rb),
        in_specs=[pl.BlockSpec((1, c, blk_h_in, w), lambda b, i: (b, 0, i, 0)),
                  pl.BlockSpec((g, c), lambda b, i: (0, 0)),
                  pl.BlockSpec((w, w_out), lambda b, i: (0, 0)),
                  pl.BlockSpec((g, 1), lambda b, i: (0, 0)),
                  pl.BlockSpec((g, 1), lambda b, i: (0, 0))],
        out_specs=pl.BlockSpec((1, c, rows_blk, w_out),
                               lambda b, i: (b, 0, i, 0)),
        compiler_params=pltpu.CompilerParams(
            dimension_semantics=("parallel", "parallel"),
            vmem_limit_bytes=vmem_limit),
    )(x_nchw, w_gc, sel, scale, bias)
    return out


# --------------------------------------------------------------------------
# pure-jnp reference (torch forward replica, kernel_size=1, training-mode BN)
# --------------------------------------------------------------------------
def _reference(x_nchw, conv_w, gamma, beta, *, stride, group, eps=1e-5):
    n, c, h, w = x_nchw.shape
    g = group
    sigma = jnp.einsum('nchw,gc->nghw', x_nchw, conv_w.reshape(g, c))
    mean = sigma.mean(axis=(0, 2, 3), keepdims=True)
    var = sigma.var(axis=(0, 2, 3), keepdims=True)
    sigma = (sigma - mean) / jnp.sqrt(var + eps)
    sigma = sigma * gamma.reshape(1, g, 1, 1) + beta.reshape(1, g, 1, 1)
    sigma = jax.nn.softmax(sigma, axis=1)
    out = x_nchw * jnp.repeat(sigma, c // g, axis=1)
    return out[:, :, ::stride, ::stride]


if __name__ == "__main__":
    key = jax.random.PRNGKey(0)
    kernel_size, stride = 1, 2

    configs = [
        dict(n=2, c=4, h=16, w=16, group=2, force_rows=None),  # primary shape
        dict(n=1, c=6, h=15, w=17, group=3, force_rows=None),  # odd dims, 3 groups
        dict(n=1, c=8, h=30, w=28, group=2, force_rows=8),     # multi row-block path
    ]

    for cfg in configs:
        n, c, h, w, group = cfg["n"], cfg["c"], cfg["h"], cfg["w"], cfg["group"]
        g = group * kernel_size * kernel_size
        key, k_x, k_w = jax.random.split(key, 3)

        x = jax.random.normal(k_x, (n, c, h, w), dtype=jnp.float32)
        # kaiming_normal_(mode='fan_out', nonlinearity='relu'): std = sqrt(2/fan_out)
        fan_out = g * kernel_size * kernel_size
        conv_w = jax.random.normal(k_w, (g, c, kernel_size, kernel_size),
                                   dtype=jnp.float32) * math.sqrt(2.0 / fan_out)
        bn_gamma = jnp.linspace(0.5, 1.5, g, dtype=jnp.float32)
        bn_beta = jnp.linspace(-0.2, 0.2, g, dtype=jnp.float32)

        out = downsample_pasa_group_softmax(
            x, conv_w, bn_gamma, bn_beta, stride=stride, group=group,
            kernel_size=kernel_size, max_rows_per_block=cfg["force_rows"])
        out = jax.block_until_ready(out)

        ref = _reference(x, conv_w, bn_gamma, bn_beta, stride=stride, group=group)
        assert out.shape == ref.shape, (out.shape, ref.shape)
        err = float(jnp.max(jnp.abs(out - ref)))
        assert jnp.allclose(out, ref, rtol=2e-3, atol=2e-3), (cfg, err)

    print("KERNEL_OK")
</pallas_src>

<mosaic_0001>
module attributes {stable_mosaic.version = 11 : i64} {
  func.func @_stats_kernel(%arg0: i32, %arg1: i32, %arg2: memref<1x4x256xf32, #tpu.memory_space<vmem>>, %arg3: memref<2x4xf32, #tpu.memory_space<vmem>>, %arg4: memref<1x1x2x1xf32, #tpu.memory_space<vmem>>, %arg5: memref<1x1x2x1xf32, #tpu.memory_space<vmem>>) attributes {dimension_semantics = [#tpu.dimension_semantics<parallel>, #tpu.dimension_semantics<parallel>], iteration_bounds = array<i64: 2, 1>, scalar_prefetch = 0 : i64, scratch_operands = 0 : i64, tpu.core_type = #tpu.core_type<tc>, window_params = [{transform_indices = @transform_0, window_bounds = array<i64: 1, 4, 256>}, {pipeline_mode = #tpu.pipeline_mode<synchronous>, transform_indices = @transform_1, window_bounds = array<i64: 2, 4>}, {transform_indices = @transform_2, window_bounds = array<i64: 1, 1, 2, 1>}, {transform_indices = @transform_3, window_bounds = array<i64: 1, 1, 2, 1>}]} {
    %c0 = arith.constant 0 : index
    %c0_0 = arith.constant 0 : index
    %c0_1 = arith.constant 0 : index
    %0 = vector.load %arg2[%c0, %c0_0, %c0_1] : memref<1x4x256xf32, #tpu.memory_space<vmem>>, vector<1x4x256xf32>
    %1 = vector.shape_cast %0 : vector<1x4x256xf32> to vector<4x256xf32>
    %c0_2 = arith.constant 0 : index
    %c0_3 = arith.constant 0 : index
    %2 = vector.load %arg3[%c0_2, %c0_3] : memref<2x4xf32, #tpu.memory_space<vmem>>, vector<2x4xf32>
    %cst = arith.constant dense<0.000000e+00> : vector<2x256xf32>
    %3 = tpu.matmul %2, %1, %cst {dimension_numbers = #tpu.dot_dimension_numbers<[1], [0], [0], [1], [0, 0, 1, 1], [], []>} : vector<2x4xf32>, vector<4x256xf32>, vector<2x256xf32> -> vector<2x256xf32>
    %cst_4 = arith.constant dense<0.000000e+00> : vector<2xf32>
    %4 = vector.multi_reduction <add>, %3, %cst_4 [1] : vector<2x256xf32> to vector<2xf32>
    %5 = vector.shape_cast %4 : vector<2xf32> to vector<2x1xf32>
    %6 = vector.shape_cast %5 : vector<2x1xf32> to vector<1x1x2x1xf32>
    %c0_5 = arith.constant 0 : index
    %c0_6 = arith.constant 0 : index
    %c0_7 = arith.constant 0 : index
    %c0_8 = arith.constant 0 : index
    %7 = vector.load %arg4[%c0_5, %c0_6, %c0_7, %c0_8] : memref<1x1x2x1xf32, #tpu.memory_space<vmem>>, vector<1x1x2x1xf32>
    tpu.vector_store %arg4[%c0_5, %c0_6, %c0_7, %c0_8], %6 {strides = array<i32>} : memref<1x1x2x1xf32, #tpu.memory_space<vmem>>, vector<1x1x2x1xf32>,
    %8 = arith.mulf %3, %3 : vector<2x256xf32>
    %cst_9 = arith.constant dense<0.000000e+00> : vector<2xf32>
    %9 = vector.multi_reduction <add>, %8, %cst_9 [1] : vector<2x256xf32> to vector<2xf32>
    %10 = vector.shape_cast %9 : vector<2xf32> to vector<2x1xf32>
    %11 = vector.shape_cast %10 : vector<2x1xf32> to vector<1x1x2x1xf32>
    %c0_10 = arith.constant 0 : index
    %c0_11 = arith.constant 0 : index
    %c0_12 = arith.constant 0 : index
    %c0_13 = arith.constant 0 : index
    %12 = vector.load %arg5[%c0_10, %c0_11, %c0_12, %c0_13] : memref<1x1x2x1xf32, #tpu.memory_space<vmem>>, vector<1x1x2x1xf32>
    tpu.vector_store %arg5[%c0_10, %c0_11, %c0_12, %c0_13], %11 {strides = array<i32>} : memref<1x1x2x1xf32, #tpu.memory_space<vmem>>, vector<1x1x2x1xf32>,
    return
  }
  func.func @transform_0(%arg0: i32, %arg1: i32) -> (i32, i32, i32) {
    %c0_i32 = arith.constant 0 : i32
    %c0_i32_0 = arith.constant 0 : i32
    return %arg0, %c0_i32, %arg1 : i32, i32, i32
  }
  func.func @transform_1(%arg0: i32, %arg1: i32) -> (i32, i32) {
    %c0_i32 = arith.constant 0 : i32
    %c0_i32_0 = arith.constant 0 : i32
    %c0_i32_1 = arith.constant 0 : i32
    return %c0_i32, %c0_i32_0 : i32, i32
  }
  func.func @transform_2(%arg0: i32, %arg1: i32) -> (i32, i32, i32, i32) {
    %c0_i32 = arith.constant 0 : i32
    %c0_i32_0 = arith.constant 0 : i32
    %c0_i32_1 = arith.constant 0 : i32
    return %arg0, %arg1, %c0_i32, %c0_i32_0 : i32, i32, i32, i32
  }
  func.func @transform_3(%arg0: i32, %arg1: i32) -> (i32, i32, i32, i32) {
    %c0_i32 = arith.constant 0 : i32
    %c0_i32_0 = arith.constant 0 : i32
    %c0_i32_1 = arith.constant 0 : i32
    return %arg0, %arg1, %c0_i32, %c0_i32_0 : i32, i32, i32, i32
  }
}

</mosaic_0001>

<bundles_post_ra>
// kernel: tpu_custom_call.1
= control target key start
LH: loop header
LB: loop body
LE: loop exit
PB: predicated region body
PF: predicated region fallthrough
CT: control target
= control target key end

     0   :  { %9 = vsyncpa [#allocation3], 0  ;;  %s767_s0 = inlined_call_operand.hbm [shape: f32[2,4,256], index: 0, kind: input, shape index: {}]   ;;  %s768_s1 = inlined_call_operand.vmem [shape: f32[2,4], index: 1, kind: input, shape index: {}]   ;;  %s769_s2 = inlined_call_operand.vmem [shape: f32[2,1,2,1], index: 2, kind: output, shape index: {0}]   ;;  %s770_s3 = inlined_call_operand.vmem [shape: f32[2,1,2,1], index: 3, kind: output, shape index: {1}]  }
   0x1   :  { %11 = vsyncpa [#allocation3 + $0x1], 0  ;;  %s636_s12 = smov 0   ;;  %s638_s13 = smov 0  }
   0x2   :  { %s640_s14 = smov 0   ;;  %s642_s15 = smov 0  }
   0x3   :  { %s644_s16 = smov 0   ;;  %s646_s17 = smov 0  }
   0x4 LB: > { %s458_s18 = sadd.s32 4294967295, %s612_s17   ;;  %s29_s19 = sadd.s32 1, %s608_s16  ;;  %s612_s17 = sphi %s646_s17, %s17_s17   ;;  %s608_s16 = sphi %s644_s16, %s780_s16   ;;  %s604_s15 = sphi %s642_s15, %s779_s15   ;;  %s600_s14 = sphi %s640_s14, %s778_s14   ;;  %s596_s13 = sphi %s638_s13, %s777_s13   ;;  %s592_s12 = sphi %s636_s12, %s776_s12  }
   0x5   : > { %p31_p0 = scmp.ge.s32.totalorder %s29_s19, 2  ;;  %s38_s20 = sadd.s32 1, %s600_s14 }
   0x6   : > { %p45_p1 = scmp.ne.s32.totalorder %s600_s14, %s596_s13  ;;  %p46_p2 = scmp.eq.s32.totalorder %s612_s17, 0 }
   0x7   : > { %s782_s19 = smov (%p31_p0, %s29_s19), 0  ;;  %p51_p4 = scmp.ne.s32.totalorder %s596_s13, %s592_s12 }
   0x8   : > { %p672_p3 = por %p46_p2, %p45_p1  ;;  %s33_s22 = ssub.s32 %s608_s16, %s782_s19 }
   0x9   : > { %p52_p5 = scmp.eq.s32.totalorder %s458_s18, 0  ;;  %p36_p6 = scmp.eq.s32.totalorder %s33_s22, 0 }
   0xa   : > { %p481_p8 = scmp.lt.s32.totalorder %s612_s17, 2  ;;  %s155_s25 = sand.u32 1, %s600_s14  }
   0xb   : > { %p679_p7 = por %p52_p5, %p51_p4  ;;  %s474_s26 = sshll.u32 %s608_s16, 7 }
   0xc   : > { %s685_s24 = scalar_select %p36_p6, %s600_s14, %s38_s20  }
   0xd   : > { %s462_s27 = sshll.u32 %s155_s25, 3  ;;  %s692_s30 = scalar_lea.hbm %s767_s0, %s474_s26 }
   0xe   : > { %s159_s4 = scalar_lea.vmem [#allocation2], %s462_s27  ;;  %p696_p9 = pnand %p481_p8, %p672_p3 }
   0xf   : > { %s169_s5 = sshll.u32 %s159_s4, 4  ;;  %s156_s7 = scalar_lea.sflag [#allocation3], %s155_s25  ;;  %s700_s5 = int_to_ptr.vmem [resolvable:$true] %s169_s5 }
  0x10   : > { %s532_s8 = scalar_lea.hbm %s692_s30, 128  ;;  %p534_p13 = pneg %p696_p9 }
  0x11   : > { %p533_p12 = scmp.ne.s32.totalorder %s692_s30, %s532_s8  ;;  %s537_s11 = scalar_lea.hbm %s767_s0, 256 }
  0x12   : > { %p538_p2 = scmp.lt.u32.totalorder %s692_s30, %s767_s0  ;;  %p539_p3 = scmp.lt.u32.totalorder %s537_s11, %s532_s8 }
  0x13   : > { %p535_p0 = pnand %p534_p13, %p533_p12  ;;  %p541_p5 = scmp.lt.u32.totalorder %s532_s8, %s692_s30 }
  0x14   : > { %p540_p4 = por %p539_p3, %p538_p2 }
  0x15   : > { %p536_p1 = pneg %p535_p0 }
  0x16   : > { %p542_p6 = por %p541_p5, %p540_p4 }
  0x18   : > { %p543_p8 = pnand %p542_p6, %p536_p1 }
  0x1a   : > { %546 = shalt.err (!%p543_p8)
}
  0x1b   : > { %s547_s20 = scalar_lea.vmem %s700_s5, 128  ;;  %s614_s21 = smov [#allocation2]  }
  0x1c   : > { %p548_p12 = scmp.ne.s32.totalorder %s700_s5, %s547_s20  ;;  %s552_s22 = sshll.u32 %s614_s21, 4  ;;  %s553_s22 = int_to_ptr.vmem [resolvable:$false] %s552_s22 }
  0x1d   : > { %s554_s25 = scalar_lea.vmem %s553_s22, 256  ;;  %p555_p11 = scmp.lt.s32.totalorder %s700_s5, %s553_s22 }
  0x1e   : > { %p550_p0 = pnand %p548_p12, %p534_p13  ;;  %p556_p2 = scmp.lt.s32.totalorder %s554_s25, %s547_s20 }
  0x20   : > { %p551_p10 = pneg %p550_p0  ;;  %p557_p3 = por %p556_p2, %p555_p11 }
  0x22   : > { %p558_p4 = pnand %p557_p3, %p551_p10 }
  0x24   : > { %561 = shalt.err (!%p558_p4)
}
  0x25   : > { %480 = dma.hbm_to_vmem [thread:$0]  (!%p696_p9), %s692_s30, 128, %s700_s5, %s156_s7  }
  0x26   : > { %p774_p1 = scmp.lt.s32.totalorder %s612_s17, 3  ;;  %p775_p5 = scmp.ge.s32.totalorder %s612_s17, 1 }
  0x28   : > { %p175_p13 = pnand %p775_p5, %p774_p1 }
  0x29   : > { %s180_s26 = sand.u32 (!%p175_p13), 1, %s596_s13  }
  0x2a   : > { %178 = sbr.rel (%p175_p13) target bundleno = 418 (0x1a2), region = 28  ;;  %s466_s27 = sshll.u32 (!%p175_p13), %s180_s26, 3 }
  0x2b   : > { %s181_s28 = scalar_lea.sflag (!%p175_p13), [#allocation3], %s180_s26  ;;  %s184_s29 = scalar_lea.vmem (!%p175_p13), [#allocation2], %s466_s27 }
  0x31   : > { %587 = dma.done.wait (%p679_p7), %s181_s28, 128  }
  0x32   : > { %589 = vsyncadd (%p679_p7), %s181_s28, 4294967168  ;;  %v615_v0 = vmov 0.0   ;;  %v231_v1 = vld [vmem:[%s184_s29] sm:$0xff]  ;;  %vm239_vm0 = vcmask 1043456   ;;  %vm235_vm1 = vcmask 31744   ;;  %vm315_vm2 = vcmask 1041408  }
  0x33   : > { %308 = vmatprep.mubr.f32.mxu0 %v615_v0  ;;  %v234_v2 = vcombine.high %v231_v1, %v231_v1  ;;  %v232_v3 = vld [vmem:[%s768_s1] sm:$0x3]  ;;  %p217_p7 = scmp.lt.s32.totalorder %s604_s15, 1  ;;  %vm321_vm3 = vcmask 1024  }
  0x35   : > { %469 = vmatprep.subr.msk.mxu0 %vm239_vm0, %v234_v2  ;;  %s784_s15 = smov (!%p217_p7, %s604_s15), 1 }
  0x36   : > { %470 = vmatpush1.msk.msra.mxu0 %vm239_vm0, %v231_v1  ;;  %s467_s23 = sshll.u32 %s784_s15, 1 }
  0x37   : > { %471 = vmatmul.mubr.msk.f32.vlgmr.msra.gmra.mrb[0].mxu0 %vm235_vm1, %v232_v3  ;;  %s223_s7 = scalar_lea.vmem %s769_s2, %s467_s23  ;;  %s230_s10 = scalar_lea.vmem %s770_s3, %s467_s23 }
 0x10a   : > { %v310_v4 = vpop.f32.mrb[0].mxu0 }
 0x10b   : > { %v323_v5 = vmul.f32 %v310_v4, %v310_v4  ;;  %v312_v6 = vpop.f32.mrb[1].mxu0  ;;  %v316_v7 = vsel %vm315_vm2, %v310_v4, 0.0 }
 0x10c   : > { %v317_v8 = vsel %vm315_vm2, %v312_v6, 0.0  ;;  %v324_v9 = vmul.f32 %v312_v6, %v312_v6 }
 0x10d   : > { %v318_v10 = vadd.f32 %v317_v8, %v316_v7  ;;  %v325_v11 = vsel %vm315_vm2, %v323_v5, 0.0 }
 0x10e   : > { %v326_v12 = vsel %vm315_vm2, %v324_v9, 0.0 }
 0x10f   : > { %319 = vadd.xlane.f32.xlu0 %v318_v10  ;;  %v327_v13 = vadd.f32 %v326_v12, %v325_v11 }
 0x113   : > { %328 = vadd.xlane.f32.xlu0 %v327_v13 }
 0x19c   : > { %v320_v14 = vpop.xlane.xlu0 %319 }
 0x19d   : > { %322 = vst.msk [vmem:[%s223_s7] sm:$0x3] %vm321_vm3, %v320_v14 }
 0x1a0   : > { %v329_v15 = vpop.xlane.xlu0 %328 }
 0x1a1   : > { %330 = vst.msk [vmem:[%s230_s10] sm:$0x3] %vm321_vm3, %v329_v15 }
 0x1a2 PF: > { %s17_s17 = sadd.s32 1, %s612_s17   ;;  %s776_s12 = smov %s596_s13 }
 0x1a3   : > { %p14_p9 = scmp.ge.s32.totalorder %s17_s17, 4   ;;  %s777_s13 = smov %s600_s14 }
 0x1a4   : > { %s778_s14 = smov %s685_s24  ;;  %s779_s15 = smov %s608_s16 }
 0x1a5   : > { %s780_s16 = smov %s782_s19  ;;  %16 = sbr.rel (!%p14_p9) target bundleno = 4 (0x4), region = 80 }
 0x1ac   :  { %376 = vsyncpa [#allocation3], 1 }
 0x1ad   :  { %378 = vsyncpa [#allocation3 + $0x1], 1 }

</bundles_post_ra>
